<compile_context>
chip_gen: v6e
topology: v6e:2x2x1
jax: 0.10.0
libtpu: 0.0.40
codegen_flags: <defaults>
</compile_context>

<pallas_src>
import functools

import numpy as np
import jax
import jax.numpy as jnp
from jax import lax
from jax.experimental import pallas as pl
from jax.experimental.pallas import tpu as pltpu


# MXU-native matmul operand dtype (accumulation is always f32).  Set to
# jnp.float32 to recover exact f32 forward semantics (reference matches either).
MATMUL_DTYPE = jnp.bfloat16


def _round_up(a, m):
    return ((a + m - 1) // m) * m


def _linear_relu(h, w_ref, b_ref):
    """x @ W (bf16 operands, f32 accumulate) + folded-BN bias, ReLU in f32."""
    y = jnp.dot(h.astype(w_ref.dtype), w_ref[...],
                preferred_element_type=jnp.float32)
    return jnp.maximum(y + b_ref[...], 0.0)


# ----------------------------------------------------------------------------
# Fused kernel.
# Grid: (batch tiles [parallel], point chunks [arbitrary]).
# feat_acc: (tb, feat_dim) running max over point chunks (VMEM scratch).
# grp4 : (nm*4, nm*4) 0/1, sums within each quaternion group of 4.
# sel4 : (nm*4, nm*4) 0/1, broadcasts element 0 of each quaternion to its group.
# cum3 : (nm*3, nm*3) 0/1, in-group (triplet) cumulative sum.
# Output: one packed lane-dense block (tb, ncols) = [q | Z | weights | 0-pad].
# ----------------------------------------------------------------------------
def mbn_kernel(x_ref, w1, b1, w2, b2, w3, b3, w4, b4,
               wr1, br1, wr2, br2, wh, bh, grp4, sel4, cum3,
               out_ref, feat_acc, *, tb, chunk, nm, ncols):
    j = pl.program_id(1)
    din = x_ref.shape[-1]
    fd = feat_acc.shape[-1]

    # --- per-point MLP on a (tb*chunk, C) slab (fills the MXU M dimension) ---
    h = x_ref[...].reshape(tb * chunk, din)
    h = _linear_relu(h, w1, b1)
    h = _linear_relu(h, w2, b2)
    h = _linear_relu(h, w3, b3)
    h = _linear_relu(h, w4, b4)                         # (tb*chunk, feat_dim)

    # MaxPool2d((num_points, 1)) == max over the point axis, per batch item;
    # accumulated across point chunks in VMEM scratch.
    m = jnp.max(h.reshape(tb, chunk, fd), axis=1)       # (tb, feat_dim)

    @pl.when(j == 0)
    def _():
        feat_acc[...] = jnp.full_like(feat_acc, -jnp.inf)

    feat_acc[...] = jnp.maximum(feat_acc[...], m)

    # --- head + post-processing, only once per batch tile (last point chunk) ---
    @pl.when(j == pl.num_programs(1) - 1)
    def _():
        g = _linear_relu(feat_acc[...], wr1, br1)
        g = _linear_relu(g, wr2, br2)                   # (tb, 256)

        # One fused head matmul: cols [0,4nm)=q, [4nm,7nm)=l, [7nm,8nm)=w.
        heads = jnp.dot(g.astype(wh.dtype), wh[...],
                        preferred_element_type=jnp.float32) + bh[...]
        q = heads[:, : nm * 4]
        l = heads[:, nm * 4: nm * 7]
        wlogit = heads[:, nm * 7: nm * 8]

        # Quaternions: per-group L2 normalisation + sign canonicalisation,
        # lane-dense via tiny 0/1 matmuls (kept f32: exact, negligible cost).
        # Sign uses the UNnormalised q0; normalisation is a positive scale so
        # the sign is identical to PyTorch's test on the normalised component
        # (q0 == 0 maps to -1 in both).
        sumsq = jnp.dot(q * q, grp4[...], preferred_element_type=jnp.float32)
        q0 = jnp.dot(q, sel4[...], preferred_element_type=jnp.float32)
        inv_norm = lax.rsqrt(jnp.maximum(sumsq, 1e-24))  # EUP rsqrt
        sign = jnp.where(q0 > 0.0, 1.0, -1.0)
        qn = q * inv_norm * sign

        # Z: softplus, in-triplet cumulative sum, clamp, negate.
        dz = jnp.logaddexp(l, 0.0)
        zcum = jnp.dot(dz, cum3[...], preferred_element_type=jnp.float32)
        zb = -jnp.clip(zcum, 1e-12, 900.0)

        # Mixture weights: sigmoid (exp on EUP, tiny divide on VPU).
        wts = 1.0 / (1.0 + jnp.exp(-wlogit))

        packed = jnp.concatenate([qn, zb, wts], axis=-1)     # (tb, nm*8)
        pad = ncols - nm * 8
        if pad:
            packed = jnp.concatenate(
                [packed, jnp.zeros((tb, pad), jnp.float32)], axis=-1)
        out_ref[...] = packed                                # single full store


# ----------------------------------------------------------------------------
# Tiling: largest batch tile / point chunk that fits the VMEM budget, targeting
# 512-1024 matmul rows per grid step.  B is padded to a multiple of the tile so
# awkward batch sizes never collapse to one giant block.
# ----------------------------------------------------------------------------
def _choose_tiling(b, n, din, feat_dim, target_rows=1024,
                   budget_bytes=32 * 1024 * 1024):
    widths = 64 + 128 + 128 + feat_dim
    per_row = (3 * din + widths) * 4 + widths * 2        # f32 acts + bf16 copies
    rows_cap = max(8, budget_bytes // max(per_row, 1))
    rows = min(max(target_rows, 8), rows_cap)

    if b * n <= rows:                     # whole problem fits one grid step
        return b, n, 1, b                 # block dims == array dims: always legal

    # Point chunk: largest divisor of n that is a multiple of 8 (or n itself)
    # and leaves room for >=8 batch items.  Fallback: never split illegally.
    divisors = [d for d in range(1, n + 1) if n % d == 0]
    good = [d for d in divisors if (d % 8 == 0 or d == n) and d * 8 <= rows]
    chunk = max(good) if good else n
    n_chunks = n // chunk

    tb = max(8, ((rows // chunk) // 8) * 8)
    if tb >= b:
        tb = _round_up(b, 8)
    bp = _round_up(b, tb)
    return tb, chunk, n_chunks, bp


def _vmem_limit_bytes(tb, chunk, din, feat_dim, nm, ncols):
    """Per-step VMEM estimate * 2 margin, floor 16 MiB, cap 56 MiB (v7x-safe)."""
    rows = tb * chunk
    widths = 64 + 128 + 128 + feat_dim
    act = rows * (din + widths) * 4 + rows * widths * 2
    wbytes = 4 * (din * 64 + 64 * 128 + 128 * 128 + 128 * feat_dim
                  + feat_dim * 256 + 256 * 256 + 256 * nm * 8)    # bf16, 2 bufs
    misc = (2 * rows * din * 4 + 2 * tb * ncols * 4 + tb * feat_dim * 4
            + tb * (3 * 256 + 4 * ncols) * 4
            + ((nm * 4) ** 2 * 2 + (nm * 3) ** 2) * 8
            + (2 << 20))
    est = act + wbytes + misc
    return int(min(max(2 * est, 16 << 20), 56 << 20))


# ----------------------------------------------------------------------------
# Parameter construction (deterministic, synthetic) with eval-mode BN folding.
# ----------------------------------------------------------------------------
def _fold_bn(w, gamma, beta, mean, var, eps=1e-5):
    """Fold eval-mode BatchNorm into a bias-free linear layer. w: (in, out)."""
    scale = gamma / jnp.sqrt(var + eps)
    return w * scale[None, :], (beta - mean * scale)[None, :]


def init_params(key, input_dim, feat_dim, nm):
    dims = [(input_dim, 64), (64, 128), (128, 128), (128, feat_dim),
            (feat_dim, 256), (256, 256)]
    keys = jax.random.split(key, 6 * 5 + 6)
    params = {}
    ki = 0
    names = ["conv1", "conv2", "conv3", "conv4", "rot1", "rot2"]
    for name, (din, dout) in zip(names, dims):
        w = 0.1 * jax.random.normal(keys[ki], (din, dout), jnp.float32); ki += 1
        gamma = 1.0 + 0.1 * jax.random.normal(keys[ki], (dout,), jnp.float32); ki += 1
        beta = 0.1 * jax.random.normal(keys[ki], (dout,), jnp.float32); ki += 1
        mean = 0.05 * jax.random.normal(keys[ki], (dout,), jnp.float32); ki += 1
        var = 0.5 + jnp.abs(jax.random.normal(keys[ki], (dout,), jnp.float32)); ki += 1
        wf, bf = _fold_bn(w, gamma, beta, mean, var)
        params[name] = (wf, bf)
    for name, dout in [("q", nm * 4), ("l", nm * 3), ("w", nm)]:
        w = 0.1 * jax.random.normal(keys[ki], (256, dout), jnp.float32); ki += 1
        b = 0.1 * jax.random.normal(keys[ki], (dout,), jnp.float32); ki += 1
        params[name] = (w, b[None, :])
    return params


# ----------------------------------------------------------------------------
# Wrapper
# ----------------------------------------------------------------------------
@functools.partial(jax.jit, static_argnames=("feat_dim", "nm"))
def mbn_forward(x, params, *, feat_dim, nm):
    B, N, Din = x.shape
    cd = MATMUL_DTYPE

    (w1, b1), (w2, b2), (w3, b3), (w4, b4) = (
        params["conv1"], params["conv2"], params["conv3"], params["conv4"])
    (wr1, br1), (wr2, br2) = params["rot1"], params["rot2"]
    (wq, bq), (wl, bl), (ww, bw) = params["q"], params["l"], params["w"]

    # Pre-cast matmul weights to the MXU dtype once (biases stay f32).
    w1c, w2c, w3c, w4c = (w.astype(cd) for w in (w1, w2, w3, w4))
    wr1c, wr2c = wr1.astype(cd), wr2.astype(cd)
    w_head = jnp.concatenate([wq, wl, ww], axis=1).astype(cd)   # (256, nm*8)
    b_head = jnp.concatenate([bq, bl, bw], axis=1)              # (1, nm*8)

    # Constant group matrices for the fused post-processing (trace-time numpy).
    i4 = np.arange(nm * 4)
    same4 = (i4[:, None] // 4) == (i4[None, :] // 4)
    grp4 = jnp.asarray(same4, dtype=jnp.float32)
    sel4 = jnp.asarray(same4 & ((i4[:, None] % 4) == 0), dtype=jnp.float32)
    i3 = np.arange(nm * 3)
    cum3 = jnp.asarray(((i3[:, None] // 3) == (i3[None, :] // 3))
                       & ((i3[:, None] % 3) <= (i3[None, :] % 3)),
                       dtype=jnp.float32)

    ncols = _round_up(nm * 8, 128)                  # lane-dense packed output
    tb, chunk, n_chunks, Bp = _choose_tiling(B, N, Din, feat_dim)
    assert Bp % tb == 0 and N % chunk == 0
    x_p = x if Bp == B else jnp.pad(x, ((0, Bp - B), (0, 0), (0, 0)))

    # Constant-index weight blocks are staged once (index never changes).
    # TODO(synk): on v7x, pipeline_mode=pl.Buffered(1) here reclaims the unused
    # second staging buffer at large feat_dim.
    def const_spec(shape):
        return pl.BlockSpec(shape, lambda i, j: (0,) * len(shape))

    packed = pl.pallas_call(
        functools.partial(mbn_kernel, tb=tb, chunk=chunk, nm=nm, ncols=ncols),
        out_shape=jax.ShapeDtypeStruct((Bp, ncols), jnp.float32),
        grid=(Bp // tb, n_chunks),
        in_specs=[
            pl.BlockSpec((tb, chunk, Din), lambda i, j: (i, j, 0)),
            const_spec(w1c.shape), const_spec(b1.shape),
            const_spec(w2c.shape), const_spec(b2.shape),
            const_spec(w3c.shape), const_spec(b3.shape),
            const_spec(w4c.shape), const_spec(b4.shape),
            const_spec(wr1c.shape), const_spec(br1.shape),
            const_spec(wr2c.shape), const_spec(br2.shape),
            const_spec(w_head.shape), const_spec(b_head.shape),
            const_spec(grp4.shape), const_spec(sel4.shape), const_spec(cum3.shape),
        ],
        out_specs=pl.BlockSpec((tb, ncols), lambda i, j: (i, 0)),
        scratch_shapes=[pltpu.VMEM((tb, feat_dim), jnp.float32)],
        compiler_params=pltpu.CompilerParams(
            # TODO(synk): on v7x use core_parallel (or pl.core_map) on the batch
            # axis to engage both TensorCores; "parallel" kept for portability.
            dimension_semantics=("parallel", "arbitrary"),
            vmem_limit_bytes=_vmem_limit_bytes(tb, chunk, Din, feat_dim, nm, ncols)),
    )(x_p, w1c, b1, w2c, b2, w3c, b3, w4c, b4,
      wr1c, br1, wr2c, br2, w_head, b_head, grp4, sel4, cum3)

    # Free XLA slices: drop batch padding, split q / Z / weights, reshape to
    # the PyTorch API shapes (B*nm, 4) and (B*nm, 3).
    packed = packed[:B]
    q_bn = packed[:, : nm * 4].reshape(B * nm, 4)
    z_bn = packed[:, nm * 4: nm * 7].reshape(B * nm, 3)
    weights = packed[:, nm * 7: nm * 8]
    return q_bn, z_bn, weights


# ----------------------------------------------------------------------------
# Pure-JAX reference (same folded params, same matmul operand precision).
# ----------------------------------------------------------------------------
def mbn_reference(x, params, *, feat_dim, nm):
    cd = MATMUL_DTYPE
    B, N, Din = x.shape

    def mm(a, w):
        return jnp.dot(a.astype(cd), w.astype(cd),
                       preferred_element_type=jnp.float32)

    h = x.reshape(B * N, Din)
    for name in ["conv1", "conv2", "conv3", "conv4"]:
        w, b = params[name]
        h = jnp.maximum(mm(h, w) + b, 0.0)
    feat = jnp.max(h.reshape(B, N, feat_dim), axis=1)
    for name in ["rot1", "rot2"]:
        w, b = params[name]
        feat = jnp.maximum(mm(feat, w) + b, 0.0)
    wq, bq = params["q"]; wl, bl = params["l"]; ww, bw = params["w"]
    q = (mm(feat, wq) + bq).reshape(B * nm, 4)
    dz = jax.nn.softplus(mm(feat, wl) + bl).reshape(B * nm, 3)
    weights = jax.nn.sigmoid(mm(feat, ww) + bw)
    z0 = dz[:, 0:1]; z1 = z0 + dz[:, 1:2]; z2 = z1 + dz[:, 2:3]
    zb = -jnp.clip(jnp.concatenate([z0, z1, z2], axis=1), 1e-12, 900.0)
    norm = jnp.linalg.norm(q, axis=-1, keepdims=True)
    qn = q / (norm + 1e-12)
    qn = jnp.where(qn[:, 0:1] > 0.0, 1.0, -1.0) * qn
    return qn, zb, weights


if __name__ == "__main__":
    # Small shapes consistent with the module.
    B, num_points, input_dim, feat_dim, nm = 2, 16, 4, 32, 4

    key = jax.random.PRNGKey(0)
    kx, kp = jax.random.split(key)
    x = jax.random.normal(kx, (B, num_points, input_dim), jnp.float32)
    params = init_params(kp, input_dim, feat_dim, nm)

    q_norm, zbatch, weights = mbn_forward(x, params, feat_dim=feat_dim, nm=nm)
    jax.block_until_ready((q_norm, zbatch, weights))

    q_ref, z_ref, w_ref = mbn_reference(x, params, feat_dim=feat_dim, nm=nm)
    assert q_norm.shape == (B * nm, 4)
    assert zbatch.shape == (B * nm, 3)
    assert weights.shape == (B, nm)
    # Both kernel and reference use bf16 matmul operands with f32 accumulation;
    # tolerance only covers accumulation-order differences.
    assert jnp.allclose(q_norm, q_ref, atol=1e-3, rtol=1e-3), "quaternion mismatch"
    assert jnp.allclose(zbatch, z_ref, atol=1e-3, rtol=1e-3), "Z mismatch"
    assert jnp.allclose(weights, w_ref, atol=1e-3, rtol=1e-3), "weights mismatch"

    print("KERNEL_OK")
</pallas_src>

<mosaic_0001>
module attributes {stable_mosaic.version = 11 : i64} {
  func.func @mbn_kernel(%arg0: i32, %arg1: i32, %arg2: memref<2x16x4xf32, #tpu.memory_space<vmem>>, %arg3: memref<4x64xbf16, #tpu.memory_space<vmem>>, %arg4: memref<1x64xf32, #tpu.memory_space<vmem>>, %arg5: memref<64x128xbf16, #tpu.memory_space<vmem>>, %arg6: memref<1x128xf32, #tpu.memory_space<vmem>>, %arg7: memref<128x128xbf16, #tpu.memory_space<vmem>>, %arg8: memref<1x128xf32, #tpu.memory_space<vmem>>, %arg9: memref<128x32xbf16, #tpu.memory_space<vmem>>, %arg10: memref<1x32xf32, #tpu.memory_space<vmem>>, %arg11: memref<32x256xbf16, #tpu.memory_space<vmem>>, %arg12: memref<1x256xf32, #tpu.memory_space<vmem>>, %arg13: memref<256x256xbf16, #tpu.memory_space<vmem>>, %arg14: memref<1x256xf32, #tpu.memory_space<vmem>>, %arg15: memref<256x32xbf16, #tpu.memory_space<vmem>>, %arg16: memref<1x32xf32, #tpu.memory_space<vmem>>, %arg17: memref<16x16xf32, #tpu.memory_space<vmem>>, %arg18: memref<16x16xf32, #tpu.memory_space<vmem>>, %arg19: memref<12x12xf32, #tpu.memory_space<vmem>>, %arg20: memref<2x128xf32, #tpu.memory_space<vmem>>, %arg21: memref<2x32xf32, #tpu.memory_space<vmem>>) attributes {dimension_semantics = [#tpu.dimension_semantics<parallel>, #tpu.dimension_semantics<arbitrary>], iteration_bounds = array<i64: 1, 1>, scalar_prefetch = 0 : i64, scratch_operands = 1 : i64, tpu.core_type = #tpu.core_type<tc>, window_params = [{transform_indices = @transform_0, window_bounds = array<i64: 2, 16, 4>}, {pipeline_mode = #tpu.pipeline_mode<synchronous>, transform_indices = @transform_1, window_bounds = array<i64: 4, 64>}, {pipeline_mode = #tpu.pipeline_mode<synchronous>, transform_indices = @transform_2, window_bounds = array<i64: 1, 64>}, {pipeline_mode = #tpu.pipeline_mode<synchronous>, transform_indices = @transform_3, window_bounds = array<i64: 64, 128>}, {pipeline_mode = #tpu.pipeline_mode<synchronous>, transform_indices = @transform_4, window_bounds = array<i64: 1, 128>}, {pipeline_mode = #tpu.pipeline_mode<synchronous>, transform_indices = @transform_5, window_bounds = array<i64: 128, 128>}, {pipeline_mode = #tpu.pipeline_mode<synchronous>, transform_indices = @transform_6, window_bounds = array<i64: 1, 128>}, {pipeline_mode = #tpu.pipeline_mode<synchronous>, transform_indices = @transform_7, window_bounds = array<i64: 128, 32>}, {pipeline_mode = #tpu.pipeline_mode<synchronous>, transform_indices = @transform_8, window_bounds = array<i64: 1, 32>}, {pipeline_mode = #tpu.pipeline_mode<synchronous>, transform_indices = @transform_9, window_bounds = array<i64: 32, 256>}, {pipeline_mode = #tpu.pipeline_mode<synchronous>, transform_indices = @transform_10, window_bounds = array<i64: 1, 256>}, {pipeline_mode = #tpu.pipeline_mode<synchronous>, transform_indices = @transform_11, window_bounds = array<i64: 256, 256>}, {pipeline_mode = #tpu.pipeline_mode<synchronous>, transform_indices = @transform_12, window_bounds = array<i64: 1, 256>}, {pipeline_mode = #tpu.pipeline_mode<synchronous>, transform_indices = @transform_13, window_bounds = array<i64: 256, 32>}, {pipeline_mode = #tpu.pipeline_mode<synchronous>, transform_indices = @transform_14, window_bounds = array<i64: 1, 32>}, {pipeline_mode = #tpu.pipeline_mode<synchronous>, transform_indices = @transform_15, window_bounds = array<i64: 16, 16>}, {pipeline_mode = #tpu.pipeline_mode<synchronous>, transform_indices = @transform_16, window_bounds = array<i64: 16, 16>}, {pipeline_mode = #tpu.pipeline_mode<synchronous>, transform_indices = @transform_17, window_bounds = array<i64: 12, 12>}, {transform_indices = @transform_18, window_bounds = array<i64: 2, 128>}]} {
    %c0 = arith.constant 0 : index
    %c0_0 = arith.constant 0 : index
    %c0_1 = arith.constant 0 : index
    %0 = vector.load %arg2[%c0, %c0_0, %c0_1] : memref<2x16x4xf32, #tpu.memory_space<vmem>>, vector<2x16x4xf32>
    %1 = vector.shape_cast %0 : vector<2x16x4xf32> to vector<32x4xf32>
    %2 = arith.truncf %1 : vector<32x4xf32> to vector<32x4xbf16>
    %c0_2 = arith.constant 0 : index
    %c0_3 = arith.constant 0 : index
    %3 = vector.load %arg3[%c0_2, %c0_3] : memref<4x64xbf16, #tpu.memory_space<vmem>>, vector<4x64xbf16>
    %cst = arith.constant dense<0.000000e+00> : vector<32x64xf32>
    %4 = tpu.matmul %2, %3, %cst {dimension_numbers = #tpu.dot_dimension_numbers<[1], [0], [0], [1], [0, 0, 1, 1], [], []>} : vector<32x4xbf16>, vector<4x64xbf16>, vector<32x64xf32> -> vector<32x64xf32>
    %c0_4 = arith.constant 0 : index
    %c0_5 = arith.constant 0 : index
    %5 = vector.load %arg4[%c0_4, %c0_5] : memref<1x64xf32, #tpu.memory_space<vmem>>, vector<1x64xf32>
    %6 = vector.broadcast %5 : vector<1x64xf32> to vector<32x64xf32>
    %7 = arith.addf %4, %6 : vector<32x64xf32>
    %cst_6 = arith.constant 0.000000e+00 : f32
    %8 = vector.broadcast %cst_6 : f32 to vector<32x64xf32>
    %9 = arith.maximumf %7, %8 : vector<32x64xf32>
    %10 = arith.truncf %9 : vector<32x64xf32> to vector<32x64xbf16>
    %c0_7 = arith.constant 0 : index
    %c0_8 = arith.constant 0 : index
    %11 = vector.load %arg5[%c0_7, %c0_8] : memref<64x128xbf16, #tpu.memory_space<vmem>>, vector<64x128xbf16>
    %cst_9 = arith.constant dense<0.000000e+00> : vector<32x128xf32>
    %12 = tpu.matmul %10, %11, %cst_9 {dimension_numbers = #tpu.dot_dimension_numbers<[1], [0], [0], [1], [0, 0, 1, 1], [], []>} : vector<32x64xbf16>, vector<64x128xbf16>, vector<32x128xf32> -> vector<32x128xf32>
    %c0_10 = arith.constant 0 : index
    %c0_11 = arith.constant 0 : index
    %13 = vector.load %arg6[%c0_10, %c0_11] : memref<1x128xf32, #tpu.memory_space<vmem>>, vector<1x128xf32>
    %14 = vector.broadcast %13 : vector<1x128xf32> to vector<32x128xf32>
    %15 = arith.addf %12, %14 : vector<32x128xf32>
    %cst_12 = arith.constant 0.000000e+00 : f32
    %16 = vector.broadcast %cst_12 : f32 to vector<32x128xf32>
    %17 = arith.maximumf %15, %16 : vector<32x128xf32>
    %18 = arith.truncf %17 : vector<32x128xf32> to vector<32x128xbf16>
    %c0_13 = arith.constant 0 : index
    %c0_14 = arith.constant 0 : index
    %19 = vector.load %arg7[%c0_13, %c0_14] : memref<128x128xbf16, #tpu.memory_space<vmem>>, vector<128x128xbf16>
    %cst_15 = arith.constant dense<0.000000e+00> : vector<32x128xf32>
    %20 = tpu.matmul %18, %19, %cst_15 {dimension_numbers = #tpu.dot_dimension_numbers<[1], [0], [0], [1], [0, 0, 1, 1], [], []>} : vector<32x128xbf16>, vector<128x128xbf16>, vector<32x128xf32> -> vector<32x128xf32>
    %c0_16 = arith.constant 0 : index
    %c0_17 = arith.constant 0 : index
    %21 = vector.load %arg8[%c0_16, %c0_17] : memref<1x128xf32, #tpu.memory_space<vmem>>, vector<1x128xf32>
    %22 = vector.broadcast %21 : vector<1x128xf32> to vector<32x128xf32>
    %23 = arith.addf %20, %22 : vector<32x128xf32>
    %cst_18 = arith.constant 0.000000e+00 : f32
    %24 = vector.broadcast %cst_18 : f32 to vector<32x128xf32>
    %25 = arith.maximumf %23, %24 : vector<32x128xf32>
    %26 = arith.truncf %25 : vector<32x128xf32> to vector<32x128xbf16>
    %c0_19 = arith.constant 0 : index
    %c0_20 = arith.constant 0 : index
    %27 = vector.load %arg9[%c0_19, %c0_20] : memref<128x32xbf16, #tpu.memory_space<vmem>>, vector<128x32xbf16>
    %cst_21 = arith.constant dense<0.000000e+00> : vector<32x32xf32>
    %28 = tpu.matmul %26, %27, %cst_21 {dimension_numbers = #tpu.dot_dimension_numbers<[1], [0], [0], [1], [0, 0, 1, 1], [], []>} : vector<32x128xbf16>, vector<128x32xbf16>, vector<32x32xf32> -> vector<32x32xf32>
    %c0_22 = arith.constant 0 : index
    %c0_23 = arith.constant 0 : index
    %29 = vector.load %arg10[%c0_22, %c0_23] : memref<1x32xf32, #tpu.memory_space<vmem>>, vector<1x32xf32>
    %30 = vector.broadcast %29 : vector<1x32xf32> to vector<32x32xf32>
    %31 = arith.addf %28, %30 : vector<32x32xf32>
    %cst_24 = arith.constant 0.000000e+00 : f32
    %32 = vector.broadcast %cst_24 : f32 to vector<32x32xf32>
    %33 = arith.maximumf %31, %32 : vector<32x32xf32>
    %34 = vector.shape_cast %33 : vector<32x32xf32> to vector<2x16x32xf32>
    %cst_25 = arith.constant dense<0xFF800000> : vector<2x32xf32>
    %35 = vector.multi_reduction <maximumf>, %34, %cst_25 [1] : vector<2x16x32xf32> to vector<2x32xf32>
    %c0_i32 = arith.constant 0 : i32
    %36 = arith.cmpi eq, %arg1, %c0_i32 : i32
    %37 = arith.extui %36 : i1 to i32
    %c0_i32_26 = arith.constant 0 : i32
    %38 = arith.cmpi ne, %37, %c0_i32_26 : i32
    scf.if %38 {
      %cst_33 = arith.constant 0xFF800000 : f32
      %45 = vector.broadcast %cst_33 : f32 to vector<2x32xf32>
      %c0_34 = arith.constant 0 : index
      %c0_35 = arith.constant 0 : index
      %46 = vector.load %arg21[%c0_34, %c0_35] : memref<2x32xf32, #tpu.memory_space<vmem>>, vector<2x32xf32>
      tpu.vector_store %arg21[%c0_34, %c0_35], %45 {strides = array<i32>} : memref<2x32xf32, #tpu.memory_space<vmem>>, vector<2x32xf32>,
    } else {
    }
    %c0_27 = arith.constant 0 : index
    %c0_28 = arith.constant 0 : index
    %39 = vector.load %arg21[%c0_27, %c0_28] : memref<2x32xf32, #tpu.memory_space<vmem>>, vector<2x32xf32>
    %40 = arith.maximumf %39, %35 : vector<2x32xf32>
    %c0_29 = arith.constant 0 : index
    %c0_30 = arith.constant 0 : index
    %41 = vector.load %arg21[%c0_29, %c0_30] : memref<2x32xf32, #tpu.memory_space<vmem>>, vector<2x32xf32>
    tpu.vector_store %arg21[%c0_29, %c0_30], %40 {strides = array<i32>} : memref<2x32xf32, #tpu.memory_space<vmem>>, vector<2x32xf32>,
    %c0_i32_31 = arith.constant 0 : i32
    %42 = arith.cmpi eq, %arg1, %c0_i32_31 : i32
    %43 = arith.extui %42 : i1 to i32
    %c0_i32_32 = arith.constant 0 : i32
    %44 = arith.cmpi ne, %43, %c0_i32_32 : i32
    scf.if %44 {
      %c0_33 = arith.constant 0 : index
      %c0_34 = arith.constant 0 : index
      %45 = vector.load %arg21[%c0_33, %c0_34] : memref<2x32xf32, #tpu.memory_space<vmem>>, vector<2x32xf32>
      %46 = arith.truncf %45 : vector<2x32xf32> to vector<2x32xbf16>
      %c0_35 = arith.constant 0 : index
      %c0_36 = arith.constant 0 : index
      %47 = vector.load %arg11[%c0_35, %c0_36] : memref<32x256xbf16, #tpu.memory_space<vmem>>, vector<32x256xbf16>
      %cst_37 = arith.constant dense<0.000000e+00> : vector<2x256xf32>
      %48 = tpu.matmul %46, %47, %cst_37 {dimension_numbers = #tpu.dot_dimension_numbers<[1], [0], [0], [1], [0, 0, 1, 1], [], []>} : vector<2x32xbf16>, vector<32x256xbf16>, vector<2x256xf32> -> vector<2x256xf32>
      %c0_38 = arith.constant 0 : index
      %c0_39 = arith.constant 0 : index
      %49 = vector.load %arg12[%c0_38, %c0_39] : memref<1x256xf32, #tpu.memory_space<vmem>>, vector<1x256xf32>
      %50 = vector.broadcast %49 : vector<1x256xf32> to vector<2x256xf32>
      %51 = arith.addf %48, %50 : vector<2x256xf32>
      %cst_40 = arith.constant 0.000000e+00 : f32
      %52 = vector.broadcast %cst_40 : f32 to vector<2x256xf32>
      %53 = arith.maximumf %51, %52 : vector<2x256xf32>
      %54 = arith.truncf %53 : vector<2x256xf32> to vector<2x256xbf16>
      %c0_41 = arith.constant 0 : index
      %c0_42 = arith.constant 0 : index
      %55 = vector.load %arg13[%c0_41, %c0_42] : memref<256x256xbf16, #tpu.memory_space<vmem>>, vector<256x256xbf16>
      %cst_43 = arith.constant dense<0.000000e+00> : vector<2x256xf32>
      %56 = tpu.matmul %54, %55, %cst_43 {dimension_numbers = #tpu.dot_dimension_numbers<[1], [0], [0], [1], [0, 0, 1, 1], [], []>} : vector<2x256xbf16>, vector<256x256xbf16>, vector<2x256xf32> -> vector<2x256xf32>
      %c0_44 = arith.constant 0 : index
      %c0_45 = arith.constant 0 : index
      %57 = vector.load %arg14[%c0_44, %c0_45] : memref<1x256xf32, #tpu.memory_space<vmem>>, vector<1x256xf32>
      %58 = vector.broadcast %57 : vector<1x256xf32> to vector<2x256xf32>
      %59 = arith.addf %56, %58 : vector<2x256xf32>
      %cst_46 = arith.constant 0.000000e+00 : f32
      %60 = vector.broadcast %cst_46 : f32 to vector<2x256xf32>
      %61 = arith.maximumf %59, %60 : vector<2x256xf32>
      %62 = arith.truncf %61 : vector<2x256xf32> to vector<2x256xbf16>
      %c0_47 = arith.constant 0 : index
      %c0_48 = arith.constant 0 : index
      %63 = vector.load %arg15[%c0_47, %c0_48] : memref<256x32xbf16, #tpu.memory_space<vmem>>, vector<256x32xbf16>
      %cst_49 = arith.constant dense<0.000000e+00> : vector<2x32xf32>
      %64 = tpu.matmul %62, %63, %cst_49 {dimension_numbers = #tpu.dot_dimension_numbers<[1], [0], [0], [1], [0, 0, 1, 1], [], []>} : vector<2x256xbf16>, vector<256x32xbf16>, vector<2x32xf32> -> vector<2x32xf32>
      %c0_50 = arith.constant 0 : index
      %c0_51 = arith.constant 0 : index
      %65 = vector.load %arg16[%c0_50, %c0_51] : memref<1x32xf32, #tpu.memory_space<vmem>>, vector<1x32xf32>
      %66 = vector.broadcast %65 : vector<1x32xf32> to vector<2x32xf32>
      %67 = arith.addf %64, %66 : vector<2x32xf32>
      %68 = vector.extract_strided_slice %67 {offsets = [0, 0], sizes = [2, 16], strides = [1, 1]} : vector<2x32xf32> to vector<2x16xf32>
      %69 = vector.extract_strided_slice %67 {offsets = [0, 16], sizes = [2, 12], strides = [1, 1]} : vector<2x32xf32> to vector<2x12xf32>
      %70 = vector.extract_strided_slice %67 {offsets = [0, 28], sizes = [2, 4], strides = [1, 1]} : vector<2x32xf32> to vector<2x4xf32>
      %71 = arith.mulf %68, %68 : vector<2x16xf32>
      %c0_52 = arith.constant 0 : index
      %c0_53 = arith.constant 0 : index
      %72 = vector.load %arg17[%c0_52, %c0_53] : memref<16x16xf32, #tpu.memory_space<vmem>>, vector<16x16xf32>
      %cst_54 = arith.constant dense<0.000000e+00> : vector<2x16xf32>
      %73 = tpu.matmul %71, %72, %cst_54 {dimension_numbers = #tpu.dot_dimension_numbers<[1], [0], [0], [1], [0, 0, 1, 1], [], []>} : vector<2x16xf32>, vector<16x16xf32>, vector<2x16xf32> -> vector<2x16xf32>
      %c0_55 = arith.constant 0 : index
      %c0_56 = arith.constant 0 : index
      %74 = vector.load %arg18[%c0_55, %c0_56] : memref<16x16xf32, #tpu.memory_space<vmem>>, vector<16x16xf32>
      %cst_57 = arith.constant dense<0.000000e+00> : vector<2x16xf32>
      %75 = tpu.matmul %68, %74, %cst_57 {dimension_numbers = #tpu.dot_dimension_numbers<[1], [0], [0], [1], [0, 0, 1, 1], [], []>} : vector<2x16xf32>, vector<16x16xf32>, vector<2x16xf32> -> vector<2x16xf32>
      %cst_58 = arith.constant 1.000000e-24 : f32
      %76 = vector.broadcast %cst_58 : f32 to vector<2x16xf32>
      %77 = arith.maximumf %73, %76 : vector<2x16xf32>
      %78 = math.rsqrt %77 : vector<2x16xf32>
      %cst_59 = arith.constant 0.000000e+00 : f32
      %79 = vector.broadcast %cst_59 : f32 to vector<2x16xf32>
      %80 = arith.cmpf ogt, %75, %79 : vector<2x16xf32>
      %cst_60 = arith.constant 1.000000e+00 : f32
      %cst_61 = arith.constant -1.000000e+00 : f32
      %81 = vector.broadcast %cst_60 : f32 to vector<2x16xf32>
      %82 = vector.broadcast %cst_61 : f32 to vector<2x16xf32>
      %83 = arith.select %80, %81, %82 : vector<2x16xi1>, vector<2x16xf32>
      %84 = arith.mulf %68, %78 : vector<2x16xf32>
      %85 = arith.mulf %84, %83 : vector<2x16xf32>
      %cst_62 = arith.constant 0.000000e+00 : f32
      %86 = vector.broadcast %cst_62 : f32 to vector<2x12xf32>
      %87 = arith.maximumf %69, %86 : vector<2x12xf32>
      %88 = vector.broadcast %cst_62 : f32 to vector<2x12xf32>
      %89 = arith.subf %69, %88 : vector<2x12xf32>
      %90 = arith.cmpf one, %89, %89 : vector<2x12xf32>
      %91 = vector.broadcast %cst_62 : f32 to vector<2x12xf32>
      %92 = arith.addf %69, %91 : vector<2x12xf32>
      %93 = math.absf %89 : vector<2x12xf32>
      %cst_63 = arith.constant 0.000000e+00 : f32
      %94 = vector.broadcast %cst_63 : f32 to vector<2x12xf32>
      %95 = arith.subf %94, %93 : vector<2x12xf32>
      %96 = math.exp %95 : vector<2x12xf32>
      %97 = math.log1p %96 : vector<2x12xf32>
      %98 = arith.addf %87, %97 : vector<2x12xf32>
      %99 = arith.select %90, %92, %98 : vector<2x12xi1>, vector<2x12xf32>
      %c0_64 = arith.constant 0 : index
      %c0_65 = arith.constant 0 : index
      %100 = vector.load %arg19[%c0_64, %c0_65] : memref<12x12xf32, #tpu.memory_space<vmem>>, vector<12x12xf32>
      %cst_66 = arith.constant dense<0.000000e+00> : vector<2x12xf32>
      %101 = tpu.matmul %99, %100, %cst_66 {dimension_numbers = #tpu.dot_dimension_numbers<[1], [0], [0], [1], [0, 0, 1, 1], [], []>} : vector<2x12xf32>, vector<12x12xf32>, vector<2x12xf32> -> vector<2x12xf32>
      %cst_67 = arith.constant 9.99999996E-13 : f32
      %cst_68 = arith.constant 9.000000e+02 : f32
      %102 = vector.broadcast %cst_67 : f32 to vector<2x12xf32>
      %103 = arith.maximumf %102, %101 : vector<2x12xf32>
      %104 = vector.broadcast %cst_68 : f32 to vector<2x12xf32>
      %105 = arith.minimumf %104, %103 : vector<2x12xf32>
      %cst_69 = arith.constant 0.000000e+00 : f32
      %106 = vector.broadcast %cst_69 : f32 to vector<2x12xf32>
      %107 = arith.subf %106, %105 : vector<2x12xf32>
      %cst_70 = arith.constant 0.000000e+00 : f32
      %108 = vector.broadcast %cst_70 : f32 to vector<2x4xf32>
      %109 = arith.subf %108, %70 : vector<2x4xf32>
      %110 = math.exp %109 : vector<2x4xf32>
      %cst_71 = arith.constant 1.000000e+00 : f32
      %111 = vector.broadcast %cst_71 : f32 to vector<2x4xf32>
      %112 = arith.addf %111, %110 : vector<2x4xf32>
      %cst_72 = arith.constant 1.000000e+00 : f32
      %113 = vector.broadcast %cst_72 : f32 to vector<2x4xf32>
      %114 = arith.divf %113, %112 : vector<2x4xf32>
      %115 = tpu.concatenate %85, %107, %114 in 1 : vector<2x16xf32>, vector<2x12xf32>, vector<2x4xf32> -> vector<2x32xf32>
      %cst_73 = arith.constant 0.000000e+00 : f32
      %116 = vector.broadcast %cst_73 : f32 to vector<2x96xf32>
      %117 = tpu.concatenate %115, %116 in 1 : vector<2x32xf32>, vector<2x96xf32> -> vector<2x128xf32>
      %c0_74 = arith.constant 0 : index
      %c0_75 = arith.constant 0 : index
      %118 = vector.load %arg20[%c0_74, %c0_75] : memref<2x128xf32, #tpu.memory_space<vmem>>, vector<2x128xf32>
      tpu.vector_store %arg20[%c0_74, %c0_75], %117 {strides = array<i32>} : memref<2x128xf32, #tpu.memory_space<vmem>>, vector<2x128xf32>,
    } else {
    }
    return
  }
  func.func @transform_0(%arg0: i32, %arg1: i32) -> (i32, i32, i32) {
    %c0_i32 = arith.constant 0 : i32
    %c0_i32_0 = arith.constant 0 : i32
    return %arg0, %arg1, %c0_i32 : i32, i32, i32
  }
  func.func @transform_1(%arg0: i32, %arg1: i32) -> (i32, i32) {
    %c0_i32 = arith.constant 0 : i32
    %c0_i32_0 = arith.constant 0 : i32
    %c0_i32_1 = arith.constant 0 : i32
    return %c0_i32, %c0_i32_0 : i32, i32
  }
  func.func @transform_2(%arg0: i32, %arg1: i32) -> (i32, i32) {
    %c0_i32 = arith.constant 0 : i32
    %c0_i32_0 = arith.constant 0 : i32
    %c0_i32_1 = arith.constant 0 : i32
    return %c0_i32, %c0_i32_0 : i32, i32
  }
  func.func @transform_3(%arg0: i32, %arg1: i32) -> (i32, i32) {
    %c0_i32 = arith.constant 0 : i32
    %c0_i32_0 = arith.constant 0 : i32
    %c0_i32_1 = arith.constant 0 : i32
    return %c0_i32, %c0_i32_0 : i32, i32
  }
  func.func @transform_4(%arg0: i32, %arg1: i32) -> (i32, i32) {
    %c0_i32 = arith.constant 0 : i32
    %c0_i32_0 = arith.constant 0 : i32
    %c0_i32_1 = arith.constant 0 : i32
    return %c0_i32, %c0_i32_0 : i32, i32
  }
  func.func @transform_5(%arg0: i32, %arg1: i32) -> (i32, i32) {
    %c0_i32 = arith.constant 0 : i32
    %c0_i32_0 = arith.constant 0 : i32
    %c0_i32_1 = arith.constant 0 : i32
    return %c0_i32, %c0_i32_0 : i32, i32
  }
  func.func @transform_6(%arg0: i32, %arg1: i32) -> (i32, i32) {
    %c0_i32 = arith.constant 0 : i32
    %c0_i32_0 = arith.constant 0 : i32
    %c0_i32_1 = arith.constant 0 : i32
    return %c0_i32, %c0_i32_0 : i32, i32
  }
  func.func @transform_7(%arg0: i32, %arg1: i32) -> (i32, i32) {
    %c0_i32 = arith.constant 0 : i32
    %c0_i32_0 = arith.constant 0 : i32
    %c0_i32_1 = arith.constant 0 : i32
    return %c0_i32, %c0_i32_0 : i32, i32
  }
  func.func @transform_8(%arg0: i32, %arg1: i32) -> (i32, i32) {
    %c0_i32 = arith.constant 0 : i32
    %c0_i32_0 = arith.constant 0 : i32
    %c0_i32_1 = arith.constant 0 : i32
    return %c0_i32, %c0_i32_0 : i32, i32
  }
  func.func @transform_9(%arg0: i32, %arg1: i32) -> (i32, i32) {
    %c0_i32 = arith.constant 0 : i32
    %c0_i32_0 = arith.constant 0 : i32
    %c0_i32_1 = arith.constant 0 : i32
    return %c0_i32, %c0_i32_0 : i32, i32
  }
  func.func @transform_10(%arg0: i32, %arg1: i32) -> (i32, i32) {
    %c0_i32 = arith.constant 0 : i32
    %c0_i32_0 = arith.constant 0 : i32
    %c0_i32_1 = arith.constant 0 : i32
    return %c0_i32, %c0_i32_0 : i32, i32
  }
  func.func @transform_11(%arg0: i32, %arg1: i32) -> (i32, i32) {
    %c0_i32 = arith.constant 0 : i32
    %c0_i32_0 = arith.constant 0 : i32
    %c0_i32_1 = arith.constant 0 : i32
    return %c0_i32, %c0_i32_0 : i32, i32
  }
  func.func @transform_12(%arg0: i32, %arg1: i32) -> (i32, i32) {
    %c0_i32 = arith.constant 0 : i32
    %c0_i32_0 = arith.constant 0 : i32
    %c0_i32_1 = arith.constant 0 : i32
    return %c0_i32, %c0_i32_0 : i32, i32
  }
  func.func @transform_13(%arg0: i32, %arg1: i32) -> (i32, i32) {
    %c0_i32 = arith.constant 0 : i32
    %c0_i32_0 = arith.constant 0 : i32
    %c0_i32_1 = arith.constant 0 : i32
    return %c0_i32, %c0_i32_0 : i32, i32
  }
  func.func @transform_14(%arg0: i32, %arg1: i32) -> (i32, i32) {
    %c0_i32 = arith.constant 0 : i32
    %c0_i32_0 = arith.constant 0 : i32
    %c0_i32_1 = arith.constant 0 : i32
    return %c0_i32, %c0_i32_0 : i32, i32
  }
  func.func @transform_15(%arg0: i32, %arg1: i32) -> (i32, i32) {
    %c0_i32 = arith.constant 0 : i32
    %c0_i32_0 = arith.constant 0 : i32
    %c0_i32_1 = arith.constant 0 : i32
    return %c0_i32, %c0_i32_0 : i32, i32
  }
  func.func @transform_16(%arg0: i32, %arg1: i32) -> (i32, i32) {
    %c0_i32 = arith.constant 0 : i32
    %c0_i32_0 = arith.constant 0 : i32
    %c0_i32_1 = arith.constant 0 : i32
    return %c0_i32, %c0_i32_0 : i32, i32
  }
  func.func @transform_17(%arg0: i32, %arg1: i32) -> (i32, i32) {
    %c0_i32 = arith.constant 0 : i32
    %c0_i32_0 = arith.constant 0 : i32
    %c0_i32_1 = arith.constant 0 : i32
    return %c0_i32, %c0_i32_0 : i32, i32
  }
  func.func @transform_18(%arg0: i32, %arg1: i32) -> (i32, i32) {
    %c0_i32 = arith.constant 0 : i32
    %c0_i32_0 = arith.constant 0 : i32
    return %arg0, %c0_i32 : i32, i32
  }
}

</mosaic_0001>

<bundles_post_ra>
// kernel: mbn_forward.1
= control target key start
LH: loop header
LB: loop body
LE: loop exit
PB: predicated region body
PF: predicated region fallthrough
CT: control target
= control target key end

     0   :  { %vm81_vm0 = vcmask 1041408   ;;  %vm74_vm1 = vcmask 31744   ;;  %vm179_vm2 = vcmask 523264   ;;  %vm514_vm3 = vcmask 254976   ;;  %s2052_s1 = inlined_call_operand.vmem [shape: bf16[4,64], index: 1, kind: input, shape index: {}]   ;;  %s2053_s0 = inlined_call_operand.vmem [shape: f32[2,16,4], index: 0, kind: input, shape index: {}]   ;;  %s2054_s3 = inlined_call_operand.vmem [shape: bf16[64,128], index: 3, kind: input, shape index: {}]   ;;  %s2055_s5 = inlined_call_operand.vmem [shape: bf16[128,128], index: 5, kind: input, shape index: {}]   ;;  %s2056_s2 = inlined_call_operand.vmem [shape: f32[1,64], index: 2, kind: input, shape index: {}]   ;;  %s2057_s7 = inlined_call_operand.vmem [shape: bf16[128,32], index: 7, kind: input, shape index: {}]   ;;  %s2058_s4 = inlined_call_operand.vmem [shape: f32[1,128], index: 4, kind: input, shape index: {}]   ;;  %s2059_s6 = inlined_call_operand.vmem [shape: f32[1,128], index: 6, kind: input, shape index: {}]   ;;  %s2060_s9 = inlined_call_operand.vmem [shape: bf16[32,256], index: 9, kind: input, shape index: {}]   ;;  %s2061_s11 = inlined_call_operand.vmem [shape: bf16[256,256], index: 11, kind: input, shape index: {}]   ;;  %s2062_s8 = inlined_call_operand.vmem [shape: f32[1,32], index: 8, kind: input, shape index: {}]   ;;  %s2063_s13 = inlined_call_operand.vmem [shape: bf16[256,32], index: 13, kind: input, shape index: {}]   ;;  %s2064_s10 = inlined_call_operand.vmem [shape: f32[1,256], index: 10, kind: input, shape index: {}]   ;;  %s2065_s12 = inlined_call_operand.vmem [shape: f32[1,256], index: 12, kind: input, shape index: {}]   ;;  %s2066_s15 = inlined_call_operand.vmem [shape: f32[16,16], index: 15, kind: input, shape index: {}]   ;;  %s2067_s14 = inlined_call_operand.vmem [shape: f32[1,32], index: 14, kind: input, shape index: {}]   ;;  %s2068_s16 = inlined_call_operand.vmem [shape: f32[16,16], index: 16, kind: input, shape index: {}]   ;;  %s2069_s17 = inlined_call_operand.vmem [shape: f32[12,12], index: 17, kind: input, shape index: {}]   ;;  %s2070_s18 = inlined_call_operand.vmem [shape: f32[2,128], index: 18, kind: output, shape index: {}]  }
   0x1   :  { %2073 = sst [smem:[#allocation3_spill]] %s2052_s1  ;;  %v1555_v12 = vld [vmem:[%s2055_s5 + $0x38] sm:$0xff]   ;;  %v1556_v13 = vld [vmem:[%s2055_s5 + $0x30] sm:$0xff]   ;;  %v1557_v14 = vld [vmem:[%s2055_s5 + $0x28] sm:$0xff]   ;;  %vm491_vm4 = vcmask 261120   ;;  %vm519_vm5 = vcmask 1041409  }
   0x2   :  { %2074 = sst [smem:[#allocation4_spill]] %s2053_s0  ;;  %v1558_v15 = vld [vmem:[%s2055_s5 + $0x20] sm:$0xff]   ;;  %v1559_v16 = vld [vmem:[%s2055_s5 + $0x18] sm:$0xff]   ;;  %v1560_v32 = vld [vmem:[%s2055_s5 + $0x10] sm:$0xff]   ;;  %vm1654_vm6 = vmmov 0   ;;  %vm1041_vm7 = vcmask 130048  }
   0x3   :  { %2075 = sst [smem:[#allocation5_spill]] %s2054_s3  ;;  %v1318_v19 = vld [vmem:[%s2056_s2] ss:$0 sm:$0xff]  ;;  %v1561_v33 = vld [vmem:[%s2055_s5 + $0x8] sm:$0xff]   ;;  %v1563_v35 = vld [vmem:[%s2057_s7 + $0x38] sm:$0xff]   ;;  %vm1222_vm8 = vcmask 1043456  }
   0x4   :  { %s2076_s29 = sld [smem:[#allocation3_spill]]  ;;  %v1562_v34 = vld [vmem:[%s2055_s5] sm:$0xff]   ;;  %v1564_v36 = vld [vmem:[%s2057_s7 + $0x30] sm:$0xff]   ;;  %v1565_v37 = vld [vmem:[%s2057_s7 + $0x28] sm:$0xff]   ;;  %vm1219_vm11 = vcmask 97280   ;;  %vm1310_vm13 = vcmask 228352  }
   0x5   :  { %s2077_s19 = sld [smem:[#allocation4_spill]]  ;;  %v1566_v38 = vld [vmem:[%s2057_s7 + $0x20] sm:$0xff]   ;;  %v1567_v39 = vld [vmem:[%s2057_s7 + $0x18] sm:$0xff]   ;;  %v1568_v55 = vld [vmem:[%s2057_s7 + $0x10] sm:$0xff]  }
   0x6   :  { %s2078_s26 = sld [smem:[#allocation5_spill]]  ;;  %v1321_v42 = vld [vmem:[%s2058_s4] ss:$0 sm:$0xff]  ;;  %v1569_v56 = vld [vmem:[%s2057_s7 + $0x8] sm:$0xff]  }
   0x7   :  { %v1570_v57 = vld [vmem:[%s2057_s7] sm:$0xff]  }
   0x8   :  { %v1328_v60 = vld [vmem:[%s2059_s6] ss:$0 sm:$0xff] }
   0xa   :  { %v66_v0 = vld [vmem:[%s2076_s29] sm:$0x3] }
   0xb   :  { %v60_v1 = vld [vmem:[%s2077_s19] sm:$0xff]  ;;  %v61_v2 = vld [vmem:[%s2077_s19 + $0x8] sm:$0xff]  ;;  %1543 = vmatprep.subr.msk.bf16.mxu0 %vm81_vm0, %v66_v0  ;;  %v83_v3 = vsel %vm81_vm0, %v66_v0, 0  ;;  %v62_v5 = vld [vmem:[%s2077_s19 + $0x10] sm:$0xff] }
   0xc   :  { %v64_v4 = vpack.c.bf16 %v61_v2, %v60_v1  ;;  %v63_v6 = vld [vmem:[%s2077_s19 + $0x18] sm:$0xff]  ;;  %1465 = vmatpush3.bf16.msra.mxu0 %v83_v3  ;;  %v1552_v9 = vld [vmem:[%s2078_s26 + $0x10] sm:$0xff]   ;;  %v1553_v10 = vld [vmem:[%s2078_s26 + $0x8] sm:$0xff]  }
   0xd   :  { %v65_v7 = vpack.c.bf16 %v63_v6, %v62_v5  ;;  %v1551_v8 = vld [vmem:[%s2078_s26 + $0x18] sm:$0xff]   ;;  %v1554_v11 = vld [vmem:[%s2078_s26] sm:$0xff]   ;;  %1482 = vmatprep.subr.bf16.mxu0 %v1555_v12 }
   0xe   :  { %1466 = vmatprep.mubr.msk.bf16.mxu0 %vm74_vm1, %v64_v4  ;;  %1470 = vmatprep.subr.bf16.mxu1 %v1551_v8 }
   0xf   :  { %1467 = vmatmul.mubr.msk.bf16.vlgmr.msra.gmra.mxu0 %vm74_vm1, %v65_v7  ;;  %1471 = vmatpush3.bf16.msra.mxu1 %v1551_v8 }
  0x10   :  { %1472 = vmatprep.subr.bf16.mxu1 %v1552_v9  ;;  %1483 = vmatpush3.bf16.msra.mxu0 %v1555_v12  ;;  %v1652_v12 = vmov 0  }
  0x11   :  { %1484 = vmatprep.subr.bf16.mxu0 %v1556_v13 }
  0x13   :  { %1473 = vmatpush3.bf16.msra.mxu1 %v1552_v9  ;;  %v1651_v9 = vmov -inf  }
  0x14   :  { %1474 = vmatprep.subr.bf16.mxu1 %v1553_v10  ;;  %1485 = vmatpush3.bf16.msra.mxu0 %v1556_v13  ;;  %515 = vst.msk [vmem:[#allocation2] sm:$0x3] %vm514_vm3, %v1651_v9  ;;  %v1576_v13 = vld [vmem:[%s2060_s9 + $0x4] ss:$8 sps:$4 sm:$0xff]  }
  0x15   :  { %1486 = vmatprep.subr.bf16.mxu0 %v1557_v14 }
  0x17   :  { %1475 = vmatpush3.bf16.msra.mxu1 %v1553_v10  ;;  %v1571_v10 = vld [vmem:[%s2060_s9 + $0x10] ss:$8 sps:$4 sm:$0xff]  }
  0x18   :  { %1476 = vmatprep.subr.bf16.mxu1 %v1554_v11  ;;  %1487 = vmatpush3.bf16.msra.mxu0 %v1557_v14  ;;  %v1574_v14 = vld [vmem:[%s2060_s9] ss:$8 sps:$4 sm:$0xff]  }
  0x19   :  { %1488 = vmatprep.subr.bf16.mxu0 %v1558_v15 }
  0x1b   :  { %1477 = vmatpush3.bf16.msra.mxu1 %v1554_v11  ;;  %v1573_v11 = vld [vmem:[%s2060_s9 + $0x14] ss:$8 sps:$4 sm:$0xff]  }
  0x1c   :  { %1489 = vmatpush3.bf16.msra.mxu0 %v1558_v15  ;;  %1502 = vmatprep.subr.bf16.mxu1 %v1563_v35  ;;  %v1577_v15 = vld [vmem:[%s2061_s11 + $0x70] ss:$8 sps:$4 sm:$0xff]  }
  0x1d   :  { %1490 = vmatprep.subr.bf16.mxu0 %v1559_v16 }
  0x20   :  { %1491 = vmatpush3.bf16.msra.mxu0 %v1559_v16  ;;  %v1579_v16 = vld [vmem:[%s2061_s11 + $0x74] ss:$8 sps:$4 sm:$0xff]  }
  0x21   :  { %1492 = vmatprep.subr.bf16.mxu0 %v1560_v32 }
  0x24   :  { %1493 = vmatpush3.bf16.msra.mxu0 %v1560_v32  ;;  %v1601_v32 = vld [vmem:[%s2061_s11 + $0xf0] ss:$8 sps:$4 sm:$0xff]  }
  0x25   :  { %1494 = vmatprep.subr.bf16.mxu0 %v1561_v33 }
  0x28   :  { %1495 = vmatpush3.bf16.msra.mxu0 %v1561_v33  ;;  %v1606_v33 = vld [vmem:[%s2061_s11 + $0xe4] ss:$8 sps:$4 sm:$0xff]  }
  0x29   :  { %1496 = vmatprep.subr.bf16.mxu0 %v1562_v34 }
  0x2c   :  { %1497 = vmatpush3.bf16.msra.mxu0 %v1562_v34  ;;  %v1604_v34 = vld [vmem:[%s2061_s11 + $0xe0] ss:$8 sps:$4 sm:$0xff]  }
  0x2d   :  { %818 = vmatprep.subr.bf16.mxu0 %v1579_v16  ;;  %v1619_v16 = vld [vmem:[%s2061_s11 + $0x90] ss:$8 sps:$4 sm:$0xff]  }
  0xcf   :  { %v1468_v17 = vpop.f32.mrf.mxu0 }
  0xd0   :  { %v128_v23 = vadd.f32 %v1468_v17, %v1318_v19  ;;  %v1582_v17 = vld [vmem:[%s2061_s11 + $0x64] ss:$8 sps:$4 sm:$0xff]  }
  0xd1   :  { %v119_v18 = vpop.f32.mrf.mxu0 }
  0xd2   :  { %v120_v21 = vadd.f32 %v1318_v19, %v119_v18  ;;  %v136_v29 = vmax.f32 %v128_v23, 0.0  ;;  %v1580_v18 = vld [vmem:[%s2061_s11 + $0x60] ss:$8 sps:$4 sm:$0xff]   ;;  %v1591_v23 = vld [vmem:[%s2061_s11 + $0x34] ss:$8 sps:$4 sm:$0xff]  }
  0xd3   :  { %v1469_v20 = vpop.f32.mrf.mxu0 }
  0xd4   :  { %v131_v22 = vadd.f32 %v1469_v20, %v1318_v19  ;;  %v134_v27 = vmax.f32 %v120_v21, 0.0  ;;  %v1583_v20 = vld [vmem:[%s2061_s11 + $0x50] ss:$8 sps:$4 sm:$0xff]   ;;  %v1588_v21 = vld [vmem:[%s2061_s11 + $0x44] ss:$8 sps:$4 sm:$0xff]  }
  0xd5   :  { %v122_v24 = vpop.f32.mrf.mxu0 }
  0xd6   :  { %v123_v25 = vadd.f32 %v1318_v19, %v122_v24  ;;  %v137_v26 = vmax.f32 %v131_v22, 0.0  ;;  %v1585_v19 = vld [vmem:[%s2061_s11 + $0x54] ss:$8 sps:$4 sm:$0xff]   ;;  %v1586_v22 = vld [vmem:[%s2061_s11 + $0x40] ss:$8 sps:$4 sm:$0xff]  }
  0xd7   :  { %v1589_v24 = vld [vmem:[%s2061_s11 + $0x30] ss:$8 sps:$4 sm:$0xff]  }
  0xd8   :  { %v135_v28 = vmax.f32 %v123_v25, 0.0  ;;  %v139_v31 = vpack.c.bf16 %v137_v26, %v136_v29  ;;  %v1594_v25 = vld [vmem:[%s2061_s11 + $0x24] ss:$8 sps:$4 sm:$0xff]   ;;  %v1592_v26 = vld [vmem:[%s2061_s11 + $0x20] ss:$8 sps:$4 sm:$0xff]  }
  0xd9   :  { %v1600_v29 = vld [vmem:[%s2061_s11 + $0x4] ss:$8 sps:$4 sm:$0xff]  }
  0xda   :  { %v138_v30 = vpack.c.bf16 %v135_v28, %v134_v27  ;;  %v1597_v27 = vld [vmem:[%s2061_s11 + $0x14] ss:$8 sps:$4 sm:$0xff]   ;;  %v1595_v28 = vld [vmem:[%s2061_s11 + $0x10] ss:$8 sps:$4 sm:$0xff]  }
  0xdc   :  { %1478 = vmatprep.mubr.msk.bf16.mxu1 %vm179_vm2, %v138_v30  ;;  %v1598_v30 = vld [vmem:[%s2061_s11] ss:$8 sps:$4 sm:$0xff]  }
  0xdd   :  { %1479 = vmatmul.mubr.msk.bf16.vlgmr.msra.gmra.mxu1 %vm179_vm2, %v139_v31  ;;  %v1603_v31 = vld [vmem:[%s2061_s11 + $0xf4] ss:$8 sps:$4 sm:$0xff]  }
  0xde   :  { %1503 = vmatpush3.bf16.msra.mxu1 %v1563_v35  ;;  %v1609_v35 = vld [vmem:[%s2061_s11 + $0xd4] ss:$8 sps:$4 sm:$0xff]  }
  0xdf   :  { %1504 = vmatprep.subr.bf16.mxu1 %v1564_v36 }
  0xe2   :  { %1505 = vmatpush3.bf16.msra.mxu1 %v1564_v36  ;;  %v1607_v36 = vld [vmem:[%s2061_s11 + $0xd0] ss:$8 sps:$4 sm:$0xff]  }
  0xe3   :  { %1506 = vmatprep.subr.bf16.mxu1 %v1565_v37 }
  0xe6   :  { %1507 = vmatpush3.bf16.msra.mxu1 %v1565_v37  ;;  %v1612_v37 = vld [vmem:[%s2061_s11 + $0xc4] ss:$8 sps:$4 sm:$0xff]  }
  0xe7   :  { %1508 = vmatprep.subr.bf16.mxu1 %v1566_v38 }
  0xea   :  { %1509 = vmatpush3.bf16.msra.mxu1 %v1566_v38  ;;  %v1610_v38 = vld [vmem:[%s2061_s11 + $0xc0] ss:$8 sps:$4 sm:$0xff]  }
  0xeb   :  { %1510 = vmatprep.subr.bf16.mxu1 %v1567_v39 }
  0xee   :  { %1511 = vmatpush3.bf16.msra.mxu1 %v1567_v39  ;;  %v1615_v39 = vld [vmem:[%s2061_s11 + $0xb4] ss:$8 sps:$4 sm:$0xff]  }
  0xef   :  { %1512 = vmatprep.subr.bf16.mxu1 %v1568_v55 }
  0xf2   :  { %1513 = vmatpush3.bf16.msra.mxu1 %v1568_v55 }
  0xf3   :  { %1514 = vmatprep.subr.bf16.mxu1 %v1569_v56 }
  0xf6   :  { %1515 = vmatpush3.bf16.msra.mxu1 %v1569_v56 }
  0xf7   :  { %1516 = vmatprep.subr.bf16.mxu1 %v1570_v57 }
  0xfa   :  { %1517 = vmatpush3.bf16.msra.mxu1 %v1570_v57 }
  0xfb   :  { %581 = vmatprep.subr.bf16.mxu1 %v1573_v11 }
 0x19d   :  { %v1480_v40 = vpop.f32.mrf.mxu1 }
 0x19e   :  { %v229_v46 = vadd.f32 %v1480_v40, %v1321_v42  ;;  %v1613_v40 = vld [vmem:[%s2061_s11 + $0xb0] ss:$8 sps:$4 sm:$0xff]  }
 0x19f   :  { %v220_v41 = vpop.f32.mrf.mxu1 }
 0x1a0   :  { %v221_v44 = vadd.f32 %v1321_v42, %v220_v41  ;;  %v237_v52 = vmax.f32 %v229_v46, 0.0  ;;  %v1618_v41 = vld [vmem:[%s2061_s11 + $0xa4] ss:$8 sps:$4 sm:$0xff]  }
 0x1a1   :  { %v1481_v43 = vpop.f32.mrf.mxu1 }
 0x1a2   :  { %v232_v45 = vadd.f32 %v1481_v43, %v1321_v42  ;;  %v235_v50 = vmax.f32 %v221_v44, 0.0  ;;  %v1337_v43 = vld [vmem:[%s2062_s8] ss:$0 sm:$0xff] }
 0x1a3   :  { %v223_v47 = vpop.f32.mrf.mxu1 }
 0x1a4   :  { %v224_v48 = vadd.f32 %v1321_v42, %v223_v47  ;;  %v238_v49 = vmax.f32 %v232_v45, 0.0  ;;  %v1616_v42 = vld [vmem:[%s2061_s11 + $0xa0] ss:$8 sps:$4 sm:$0xff]  }
 0x1a6   :  { %v236_v51 = vmax.f32 %v224_v48, 0.0  ;;  %v240_v54 = vpack.c.bf16 %v238_v49, %v237_v52 }
 0x1a8   :  { %v239_v53 = vpack.c.bf16 %v236_v51, %v235_v50 }
 0x1aa   :  { %1498 = vmatprep.mubr.bf16.mxu0 %v239_v53 }
 0x1ab   :  { %1499 = vmatmul.mubr.bf16.vlgmr.msra.gmra.mxu0 %v240_v54 }
 0x1ac   :  { %819 = vmatpush1.bf16.msra.mxu0 %v1577_v15  ;;  %v1621_v15 = vld [vmem:[%s2061_s11 + $0x94] ss:$8 sps:$4 sm:$0xff]  }
 0x1ad   :  { %820 = vmatprep.subr.bf16.mxu0 %v1582_v17  ;;  %v1624_v17 = vld [vmem:[%s2061_s11 + $0x84] ss:$8 sps:$4 sm:$0xff]  }
 0x1b0   :  { %821 = vmatpush1.bf16.msra.mxu0 %v1580_v18  ;;  %v1622_v18 = vld [vmem:[%s2061_s11 + $0x80] ss:$8 sps:$4 sm:$0xff]  }
 0x1b1   :  { %822 = vmatprep.subr.bf16.mxu0 %v1585_v19  ;;  %v1625_v19 = vld [vmem:[%s2063_s13 + $0x78] sm:$0xff]  }
 0x1b4   :  { %823 = vmatpush1.bf16.msra.mxu0 %v1583_v20  ;;  %v1626_v20 = vld [vmem:[%s2063_s13 + $0x38] sm:$0xff]  }
 0x1b5   :  { %824 = vmatprep.subr.bf16.mxu0 %v1588_v21  ;;  %v1627_v21 = vld [vmem:[%s2063_s13 + $0x70] sm:$0xff]  }
 0x1b8   :  { %825 = vmatpush1.bf16.msra.mxu0 %v1586_v22  ;;  %v1628_v22 = vld [vmem:[%s2063_s13 + $0x30] sm:$0xff]  }
 0x1b9   :  { %826 = vmatprep.subr.bf16.mxu0 %v1591_v23  ;;  %v1629_v23 = vld [vmem:[%s2063_s13 + $0x68] sm:$0xff]  }
 0x1bc   :  { %827 = vmatpush1.bf16.msra.mxu0 %v1589_v24  ;;  %v1630_v24 = vld [vmem:[%s2063_s13 + $0x28] sm:$0xff]  }
 0x1bd   :  { %828 = vmatprep.subr.bf16.mxu0 %v1594_v25  ;;  %v1631_v25 = vld [vmem:[%s2063_s13 + $0x60] sm:$0xff]  }
 0x1c0   :  { %829 = vmatpush1.bf16.msra.mxu0 %v1592_v26  ;;  %v1632_v26 = vld [vmem:[%s2063_s13 + $0x20] sm:$0xff]  }
 0x1c1   :  { %830 = vmatprep.subr.bf16.mxu0 %v1597_v27  ;;  %v1633_v27 = vld [vmem:[%s2063_s13 + $0x58] sm:$0xff]  }
 0x1c4   :  { %831 = vmatpush1.bf16.msra.mxu0 %v1595_v28  ;;  %v1634_v28 = vld [vmem:[%s2063_s13 + $0x18] sm:$0xff]  }
 0x1c5   :  { %832 = vmatprep.subr.bf16.mxu0 %v1600_v29  ;;  %v1635_v29 = vld [vmem:[%s2063_s13 + $0x50] sm:$0xff]  }
 0x1c8   :  { %833 = vmatpush1.bf16.msra.mxu0 %v1598_v30  ;;  %v1636_v30 = vld [vmem:[%s2063_s13 + $0x10] sm:$0xff]  }
 0x1c9   :  { %834 = vmatprep.subr.bf16.mxu0 %v1603_v31  ;;  %v536_v31 = vlaneseq }
 0x1cc   :  { %835 = vmatpush2.bf16.msra.mxu0 %v1601_v32  ;;  %v537_v32 = vshrl.u32 %v536_v31, 7 }
 0x1cd   :  { %836 = vmatprep.subr.bf16.mxu0 %v1606_v33 }
 0x1ce   :  { %v538_v33 = vsub.s32 0, %v537_v32 }
 0x1d0   :  { %837 = vmatpush2.bf16.msra.mxu0 %v1604_v34  ;;  %v534_v34 = vld [vmem:[%s2064_s10] sm:$0x3] }
 0x1d1   :  { %838 = vmatprep.subr.bf16.mxu0 %v1609_v35  ;;  %v542_v35 = vsub.s32 1, %v537_v32 }
 0x1d4   :  { %839 = vmatpush2.bf16.msra.mxu0 %v1607_v36  ;;  %v539_v36 = vrot.slane %v534_v34, %v538_v33 }
 0x1d5   :  { %840 = vmatprep.subr.bf16.mxu0 %v1612_v37  ;;  %v543_v37 = vrot.slane %v534_v34, %v542_v35 }
 0x1d8   :  { %841 = vmatpush2.bf16.msra.mxu0 %v1610_v38 }
 0x1d9   :  { %842 = vmatprep.subr.bf16.mxu0 %v1615_v39 }
 0x1dc   :  { %843 = vmatpush2.bf16.msra.mxu0 %v1613_v40 }
 0x1dd   :  { %844 = vmatprep.subr.bf16.mxu0 %v1618_v41 }
 0x1e0   :  { %845 = vmatpush2.bf16.msra.mxu0 %v1616_v42 }
 0x1e1   :  { %846 = vmatprep.subr.bf16.mxu0 %v1621_v15  ;;  %v1115_v15 = vld [vmem:[%s2068_s16] sm:$0xff] }
 0x1e4   :  { %847 = vmatpush2.bf16.msra.mxu0 %v1619_v16 }
 0x1e5   :  { %848 = vmatprep.subr.bf16.mxu0 %v1624_v17  ;;  %v1215_v17 = vld [vmem:[%s2069_s17 + $0x8] sm:$0xf] }
 0x1e8   :  { %849 = vmatpush2.bf16.msra.mxu0 %v1622_v18  ;;  %v1214_v18 = vld [vmem:[%s2069_s17] sm:$0xff]  ;;  %s1657_s17 = smov 16  }
 0x26b   :  { %v1500_v58 = vpop.f32.mrf.mxu0 }
 0x26c   :  { %v355_v0 = vadd.f32 %v1500_v58, %v1328_v60 }
 0x26d   :  { %v346_v59 = vpop.f32.mrf.mxu0 }
 0x26e   :  { %v347_v62 = vadd.f32 %v1328_v60, %v346_v59  ;;  %v363_v6 = vmax.f32 %v355_v0, 0.0 }
 0x26f   :  { %v1501_v61 = vpop.f32.mrf.mxu0 }
 0x270   :  { %v358_v63 = vadd.f32 %v1501_v61, %v1328_v60  ;;  %v361_v4 = vmax.f32 %v347_v62, 0.0 }
 0x271   :  { %v349_v1 = vpop.f32.mrf.mxu0 }
 0x272   :  { %v350_v2 = vadd.f32 %v1328_v60, %v349_v1  ;;  %v364_v3 = vmax.f32 %v358_v63, 0.0 }
 0x274   :  { %v362_v5 = vmax.f32 %v350_v2, 0.0  ;;  %v366_v8 = vpack.c.bf16 %v364_v3, %v363_v6 }
 0x276   :  { %v365_v7 = vpack.c.bf16 %v362_v5, %v361_v4 }
 0x278   :  { %1518 = vmatprep.mubr.bf16.mxu1 %v365_v7 }
 0x279   :  { %1519 = vmatmul.mubr.bf16.vlgmr.msra.gmra.mxu1 %v366_v8 }
 0x27a   :  { %601 = vmatprep.mubr.bf16.mxu1 %v1652_v12  ;;  %582 = vmatpush1.bf16.msra.mxu1 %v1571_v10  ;;  %v516_v10 = vld [vmem:[#allocation2] sm:$0x3] }
 0x27b   :  { %583 = vmatprep.subr.bf16.mxu1 %v1576_v13 }
 0x27e   :  { %584 = vmatpush1.bf16.msra.mxu1 %v1574_v14 }
 0x27f   :  { %1433 = vmatprep.subr.bf16.mxu1 %v1625_v19 }
 0x339   :  { %v1520_v44 = vpop.f32.mrf.mxu1 }
 0x33a   :  { %v481_v45 = vadd.f32 %v1520_v44, %v1337_v43 }
 0x33b   :  { %v472_v46 = vpop.f32.mrf.mxu1 }
 0x33c   :  { %v473_v47 = vadd.f32 %v1337_v43, %v472_v46  ;;  %v489_v49 = vmax.f32 %v481_v45, 0.0 }
 0x33d   :  { %v1521_v48 = vpop.f32.mrf.mxu1 }
 0x33e   :  { %v484_v50 = vadd.f32 %v1521_v48, %v1337_v43  ;;  %v487_v52 = vmax.f32 %v473_v47, 0.0  ;;  %v501_v55 = vsel %vm491_vm4, %v489_v49, -inf  ;;  %v1637_v48 = vld [vmem:[%s2063_s13 + $0x48] sm:$0xff]  }
 0x33f   :  { %v475_v51 = vpop.f32.mrf.mxu1  ;;  %v1638_v49 = vld [vmem:[%s2063_s13 + $0x8] sm:$0xff]  }
 0x340   :  { %v490_v53 = vmax.f32 %v484_v50, 0.0  ;;  %v476_v54 = vadd.f32 %v1337_v43, %v475_v51  ;;  %v492_v59 = vsel %vm491_vm4, %v487_v52, -inf  ;;  %v1639_v50 = vld [vmem:[%s2063_s13 + $0x40] sm:$0xff]  }
 0x341   :  { %v1640_v51 = vld [vmem:[%s2063_s13] sm:$0xff]  }
 0x342   :  { %v502_v56 = vsel %vm491_vm4, %v490_v53, -inf  ;;  %v488_v57 = vmax.f32 %v476_v54, 0.0  ;;  %v646_v52 = vld [vmem:[%s2065_s12] sm:$0x3] }
 0x343   :  { %v503_v58 = vmax.f32 %v501_v55, %v502_v56  ;;  %v651_v53 = vrot.slane %v646_v52, %v538_v33  ;;  %v655_v54 = vrot.slane %v646_v52, %v542_v35 }
 0x344   :  { %v493_v60 = vsel %vm491_vm4, %v488_v57, -inf }
 0x345   :  { %v504_v61 = vrot.slane %v503_v58, 4  ;;  %v494_v62 = vmax.f32 %v492_v59, %v493_v60 }
 0x347   :  { %v505_v63 = vmax.f32 %v503_v58, %v504_v61  ;;  %v495_v0 = vrot.slane %v494_v62, 4 }
 0x349   :  { %v506_v1 = vrot.slane %v505_v63, 2  ;;  %v496_v2 = vmax.f32 %v494_v62, %v495_v0 }
 0x34b   :  { %v507_v3 = vmax.f32 %v505_v63, %v506_v1  ;;  %v497_v4 = vrot.slane %v496_v2, 2  ;;  %v1653_v1 = vmov 0.0  }
 0x34d   :  { %v508_v5 = vrot.slane %v507_v3, 1  ;;  %v498_v6 = vmax.f32 %v496_v2, %v497_v4  ;;  %v1040_v2 = vld [vmem:[%s2066_s15 + $0x8] sm:$0xff] }
 0x34f   :  { %v499_v7 = vrot.slane %v498_v6, 1  ;;  %v509_v8 = vmax.f32 %v507_v3, %v508_v5  ;;  %v1039_v3 = vld [vmem:[%s2066_s15] sm:$0xff] }
 0x350   :  { %v1383_v5 = vld [vmem:[%s2067_s14] ss:$0 sm:$0xff] }
 0x351   :  { %v500_v9 = vmax.f32 %v498_v6, %v499_v7 }
 0x353   :  { %v520_v11 = vsel %vm519_vm5, %v509_v8, %v500_v9 }
 0x354   :  { %v522_v12 = vmax.f32 %v516_v10, %v520_v11 }
 0x356   :  { %524 = vst.msk [vmem:[#allocation2] sm:$0x3] %vm514_vm3, %v522_v12 }
 0x35d   :  { %v528_v13 = vld [vmem:[#allocation2] sm:$0x3] }
 0x35e   :  { %v529_v14 = vpack.c.bf16 %v528_v13, %v528_v13  ;;  %v1116_v13 = vld [vmem:[%s2068_s16 + $0x8] sm:$0xff]  ;;  %s1655_s16 = smov 112  }
 0x360   :  { %1350 = vmatmul.mubr.msk.bf16.vlgmr.msra.gmra.mxu1 %vm491_vm4, %v529_v14 }
 0x361   :  { %1434 = vmatpush3.bf16.msra.mxu1 %v1626_v20 }
 0x362   :  { %1435 = vmatprep.subr.bf16.mxu1 %v1627_v21 }
 0x365   :  { %1436 = vmatpush3.bf16.msra.mxu1 %v1628_v22 }
 0x366   :  { %1437 = vmatprep.subr.bf16.mxu1 %v1629_v23 }
 0x369   :  { %1438 = vmatpush3.bf16.msra.mxu1 %v1630_v24 }
 0x36a   :  { %1439 = vmatprep.subr.bf16.mxu1 %v1631_v25 }
 0x36d   :  { %1440 = vmatpush3.bf16.msra.mxu1 %v1632_v26 }
 0x36e   :  { %1441 = vmatprep.subr.bf16.mxu1 %v1633_v27 }
 0x371   :  { %1442 = vmatpush3.bf16.msra.mxu1 %v1634_v28 }
 0x372   :  { %1443 = vmatprep.subr.bf16.mxu1 %v1635_v29 }
 0x375   :  { %1444 = vmatpush3.bf16.msra.mxu1 %v1636_v30 }
 0x376   :  { %1445 = vmatprep.subr.bf16.mxu1 %v1637_v48 }
 0x379   :  { %1446 = vmatpush3.bf16.msra.mxu1 %v1638_v49 }
 0x37a   :  { %1447 = vmatprep.subr.bf16.mxu1 %v1639_v50 }
 0x37d   :  { %1448 = vmatpush3.bf16.msra.mxu1 %v1640_v51 }
 0x37e   :  { %1522 = vmatprep.subr.mxu1 %v1653_v1 }
 0x420   :  { %v603_v38 = vpop.f32.mrf.mxu1 }
 0x421   :  { %v604_v39 = vadd.f32 %v603_v38, %v539_v36 }
 0x422   :  { %v605_v40 = vpop.f32.mrf.mxu1 }
 0x423   :  { %v606_v41 = vadd.f32 %v605_v40, %v543_v37  ;;  %v610_v42 = vmax.f32 %v604_v39, 0.0  ;;  %v1656_v39 = vmov -1.0  }
 0x424   :  { %v607_v43 = vpop.f32.mrf.mxu1 }
 0x425   :  { %v611_v44 = vmax.f32 %v606_v41, 0.0  ;;  %v612_v47 = vpack.c.bf16 %v610_v42, %v610_v42 }
 0x426   :  { %v608_v45 = vpop.f32.mrf.mxu1 }
 0x427   :  { %v613_v46 = vpack.c.bf16 %v611_v44, %v611_v44 }
 0x429   :  { %850 = vmatprep.mubr.bf16.mxu0 %v613_v46 }
 0x42a   :  { %851 = vmatmul.mubr.bf16.vlgmr.msra.gmra.mxu0 %v612_v47 }
 0x4ea   :  { %v852_v55 = vpop.f32.mrf.mxu0 }
 0x4eb   :  { %v853_v56 = vadd.f32 %v852_v55, %v651_v53 }
 0x4ec   :  { %v854_v57 = vpop.f32.mrf.mxu0 }
 0x4ed   :  { %v855_v58 = vadd.f32 %v854_v57, %v655_v54  ;;  %v859_v59 = vmax.f32 %v853_v56, 0.0 }
 0x4ee   :  { %v856_v60 = vpop.f32.mrf.mxu0 }
 0x4ef   :  { %v860_v61 = vmax.f32 %v855_v58, 0.0  ;;  %v861_v0 = vpack.c.bf16 %v859_v59, %v859_v59 }
 0x4f0   :  { %v857_v62 = vpop.f32.mrf.mxu0 }
 0x4f1   :  { %v862_v63 = vpack.c.bf16 %v860_v61, %v860_v61 }
 0x4f3   :  { %1030 = vmatprep.mubr.bf16.mxu1 %v862_v63 }
 0x4f4   :  { %1031 = vmatmul.mubr.bf16.vlgmr.msra.gmra.mxu1 %v861_v0 }
 0x4f5   :  { %1523 = vmatpush3.msra.mxu1 %v1040_v2  ;;  %1526 = vmatprep.mubr.msk.f32.mxu1 %vm1654_vm6, %v1653_v1 }
 0x4f6   :  { %1524 = vmatprep.subr.mxu1 %v1653_v1 }
 0x4f7   :  { %1525 = vmatpush3.msra.mxu1 %v1039_v3 }
 0x4f8   :  { %1529 = vmatprep.subr.mxu1 %v1653_v1 }
 0x5b4   :  { %v1449_v4 = vpop.f32.mrf.mxu1 }
 0x5b6   :  { %v1450_v6 = vpop.f32.mrf.mxu1 }
 0x5b7   :  { %v1451_v7 = vadd.f32 %v1450_v6, %v1449_v4 }
 0x5b8   :  { %v1452_v8 = vpop.f32.mrf.mxu1 }
 0x5b9   :  { %v2019_v9 = vadd.f32 %v1451_v7, %v1383_v5 }
 0x5ba   :  { %v1453_v10 = vpop.f32.mrf.mxu1 }
 0x5bb   :  { %v1199_v11 = vand.u32 2147483647, %v2019_v9  ;;  %v1038_v12 = vmul.f32 %v2019_v9, %v2019_v9  ;;  %v1196_v27 = vmax.f32 %v2019_v9, 0.0  ;;  %vm1197_vm10 = vcmp.ne.f32.partialorder %v2019_v9, %v2019_v9 }
 0x5bc   :  { %v1299_v47 = vsub.f32 0.0, %v2019_v9 }
 0x5bd   :  { %v1200_v14 = vsub.f32 0.0, %v1199_v11  ;;  %1527 = vmatmul.mubr.msk.f32.vlgmr.msra.gmra.mxu1 %vm1041_vm7, %v1038_v12 }
 0x5be   :  { %1530 = vmatpush3.msra.mxu1 %v1116_v13  ;;  %1533 = vmatprep.mubr.msk.f32.mxu1 %vm1654_vm6, %v1653_v1  ;;  %v1300_v48 = vmul.f32 1.442695, %v1299_v47 }
 0x5bf   :  { %v1201_v16 = vmul.f32 1.442695, %v1200_v14  ;;  %1531 = vmatprep.subr.mxu1 %v1653_v1 }
 0x5c0   :  { %1532 = vmatpush3.msra.mxu1 %v1115_v15 }
 0x5c1   :  { %1641 = vpow2.f32 %v1201_v16  ;;  %1534 = vmatmul.mubr.msk.f32.vlgmr.msra.gmra.mxu1 %vm1041_vm7, %v2019_v9  ;;  %1536 = vmatprep.subr.mxu1 %v1653_v1 }
 0x5c2   :  { %1537 = vmatpush3.msk.msra.mxu1 %vm1222_vm8, %v1215_v17  ;;  %1540 = vmatprep.mubr.msk.f32.mxu1 %vm1654_vm6, %v1653_v1 }
 0x5c3   :  { %1538 = vmatprep.subr.mxu1 %v1653_v1 }
 0x5c4   :  { %1539 = vmatpush3.msra.mxu1 %v1214_v18 }
 0x5ce   :  { %v1642_v19 = vpop.eup %1641 }
 0x5cf   :  { %v1203_v20 = vadd.f32 1.0, %v1642_v19  ;;  %v1206_v21 = vmul.f32 -0.5, %v1642_v19  ;;  %v1209_v23 = vand.u32 2147483647, %v1642_v19 }
 0x5d1   :  { %1643 = vlog2.f32 %v1203_v20  ;;  %v1207_v22 = vadd.f32 1.0, %v1206_v21  ;;  %vm1210_vm9 = vcmp.lt.f32.partialorder %v1209_v23, 0.0004427343 }
 0x5d3   :  { %v1208_v26 = vmul.f32 %v1642_v19, %v1207_v22 }
 0x5de   :  { %v1644_v24 = vpop.eup %1643 }
 0x5df   :  { %v1205_v25 = vmul.f32 0.6931472, %v1644_v24 }
 0x5e1   :  { %v1211_v28 = vsel %vm1210_vm9, %v1208_v26, %v1205_v25 }
 0x5e2   :  { %v1212_v29 = vadd.f32 %v1211_v28, %v1196_v27 }
 0x5e4   :  { %v1213_v30 = vsel %vm1197_vm10, %v2019_v9, %v1212_v29 }
 0x5e5   :  { %1217 = vrot.lane.b32.xlu0 %v1213_v30, %s1655_s16 }
 0x657   :  { %v1218_v31 = vpop.permute.xlu0 %1217 }
 0x658   :  { %1541 = vmatmul.mubr.msk.f32.vlgmr.msra.gmra.mxu1 %vm1219_vm11, %v1218_v31 }
 0x67d   :  { %v1111_v32 = vpop.f32.mrf.mxu1 }
 0x67e   :  { %v1190_v33 = vmax.f32 %v1111_v32, 1e-24 }
 0x67f   :  { %v1528_v34 = vpop.f32.mrf.mxu1 }
 0x680   :  { %1645 = vrsqrt.f32 %v1190_v33 }
 0x681   :  { %v1186_v35 = vpop.f32.mrf.mxu1  ;;  %1647 = vpow2.f32 %v1300_v48 }
 0x682   :  { %vm1192_vm12 = vcmp.gt.f32.partialorder %v1186_v35, 0.0 }
 0x683   :  { %v1535_v36 = vpop.f32.mrf.mxu1  ;;  %v1193_v40 = vsel %vm1192_vm12, 1.0, %v1656_v39 }
 0x68d   :  { %v1646_v37 = vpop.eup %1645 }
 0x68e   :  { %v1194_v38 = vmul.f32 %v1646_v37, %v2019_v9  ;;  %v1648_v49 = vpop.eup %1647 }
 0x68f   :  { %v1302_v50 = vadd.f32 1.0, %v1648_v49 }
 0x690   :  { %v1195_v41 = vmul.f32 %v1194_v38, %v1193_v40 }
 0x691   :  { %1649 = vrcp.f32 %v1302_v50 }
 0x69e   :  { %v1650_v52 = vpop.eup %1649 }
 0x718   :  { %v1292_v42 = vpop.f32.mrf.mxu1 }
 0x719   :  { %v1296_v43 = vmax.f32 %v1292_v42, 1e-12 }
 0x71a   :  { %v1542_v44 = vpop.f32.mrf.mxu1 }
 0x71b   :  { %v1297_v45 = vmin.f32 %v1296_v43, 900.0 }
 0x71d   :  { %v1298_v46 = vsub.f32 0.0, %v1297_v45 }
 0x71f   :  { %1306 = vrot.lane.b32.xlu0 %v1298_v46, %s1657_s17 }
 0x791   :  { %v1307_v51 = vpop.permute.xlu0 %1306 }
 0x792   :  { %v1309_v53 = vsel %vm1041_vm7, %v1195_v41, %v1307_v51 }
 0x793   :  { %v1311_v54 = vsel %vm1310_vm13, %v1309_v53, %v1650_v52 }
 0x794   :  { %v1312_v55 = vsel %vm491_vm4, %v1311_v54, 0.0 }
 0x795   :  { %1313 = vst [vmem:[%s2070_s18] sm:$0x3] %v1312_v55 }

</bundles_post_ra>
